<compile_context>
chip_gen: v5e
topology: v5e:2x2
jax: 0.10.0
libtpu: 0.0.40
codegen_flags: <defaults>
</compile_context>

<pallas_src>
import functools

import jax
import jax.numpy as jnp
from jax.experimental import pallas as pl
from jax.experimental.pallas import tpu as pltpu

LANE = 128


def glimpse_network_kernel(x_ref, loc_ref,
                           wg_ref, bg_ref, wl_ref, bl_ref,
                           wgg_ref, bgg_ref, wlg_ref, blg_ref,
                           o_ref):
    # All refs are whole arrays resident in VMEM (single-shot, gridless).
    hg = jnp.maximum(
        jnp.dot(x_ref[...], wg_ref[...], preferred_element_type=jnp.float32)
        + bg_ref[...], 0.0)
    hl = jnp.maximum(
        jnp.dot(loc_ref[...], wl_ref[...], preferred_element_type=jnp.float32)
        + bl_ref[...], 0.0)
    acc = (jnp.dot(hg, wgg_ref[...], preferred_element_type=jnp.float32)
           + jnp.dot(hl, wlg_ref[...], preferred_element_type=jnp.float32)
           + bgg_ref[...] + blg_ref[...])
    # o_ref last dim is padded to a multiple of 128 -> lane-dense store.
    o_ref[...] = jnp.maximum(acc, 0.0).astype(o_ref.dtype)


def prepare_glimpse_params(wg, bg, wl, bl, wgg, bgg, wlg, blg):
    """One-time layout prep (NOT in the per-call path).

    Takes PyTorch-convention weights (Out, In) and biases (Out,); returns
    kernel-layout params: weights transposed to (In, Out), biases as (1, Out),
    and the output head zero-padded to a multiple of 128 lanes.
    """
    output_size = wgg.shape[0]
    out_padded = LANE * pl.cdiv(output_size, LANE)
    pad = out_padded - output_size

    def pad_out(w_t, b_row):  # w_t: (In, Out), b_row: (1, Out)
        return (jnp.pad(w_t, ((0, 0), (0, pad))),
                jnp.pad(b_row, ((0, 0), (0, pad))))

    wg_t, bg2 = wg.T, bg.reshape(1, -1)
    wl_t, bl2 = wl.T, bl.reshape(1, -1)
    wgg_t, bgg2 = pad_out(wgg.T, bgg.reshape(1, -1))
    wlg_t, blg2 = pad_out(wlg.T, blg.reshape(1, -1))
    return (wg_t, bg2, wl_t, bl2, wgg_t, bgg2, wlg_t, blg2), int(output_size)


@functools.partial(jax.jit, static_argnames=("output_size",))
def glimpse_network_forward(glimpse, location, params, output_size):
    """Pallas equivalent of GlimpseNetwork.forward."""
    wg_t, bg, wl_t, bl, wgg_t, bgg, wlg_t, blg = params
    batch = glimpse.shape[0]
    out_padded = wgg_t.shape[1]

    vmem = pl.BlockSpec(memory_space=pltpu.MemorySpace.VMEM)
    out_p = pl.pallas_call(
        glimpse_network_kernel,
        out_shape=jax.ShapeDtypeStruct((batch, out_padded), glimpse.dtype),
        in_specs=[vmem] * 10,
        out_specs=vmem,
        # Single-shot kernel: no grid, no scalar prefetch, no pipelining.
        # TODO(synk): if batch grows large, add a "parallel" batch grid axis
        # (tile_m >= 256) so v7x's two TensorCores both run; also consider
        # bf16 inputs on v6e/v7x when the matmuls are big enough to matter.
    )(glimpse, location, wg_t, bg, wl_t, bl, wgg_t, bgg, wlg_t, blg)

    # Cheap slice outside the kernel drops the lane padding.
    return out_p[:, :output_size]


if __name__ == "__main__":
    # Small shapes consistent with the module / RAM paper.
    batch = 8
    input_size = 64       # glimpse feature size
    location_size = 8     # location feature size
    internal_size = 128   # h_g / h_l size
    output_size = 32      # deliberately not a multiple of 128 (exercises padding)

    key = jax.random.PRNGKey(0)
    keys = jax.random.split(key, 10)

    def linear_init(kw, kb, in_f, out_f):
        # Mimic nn.Linear uniform(-1/sqrt(in), 1/sqrt(in)), PyTorch layout.
        bound = 1.0 / jnp.sqrt(jnp.float32(in_f))
        w = jax.random.uniform(kw, (out_f, in_f), jnp.float32, -bound, bound)
        b = jax.random.uniform(kb, (out_f,), jnp.float32, -bound, bound)
        return w, b

    wg, bg = linear_init(keys[0], keys[1], input_size, internal_size)     # fc_g
    wl, bl = linear_init(keys[2], keys[3], location_size, internal_size)  # fc_l
    wgg, bgg = linear_init(keys[4], keys[5], internal_size, output_size)  # fc_gg
    wlg, blg = linear_init(keys[6], keys[7], internal_size, output_size)  # fc_lg

    glimpse = jax.random.normal(keys[8], (batch, input_size), jnp.float32)
    location = jax.random.uniform(keys[9], (batch, location_size),
                                  jnp.float32, -1.0, 1.0)

    params, out_size = prepare_glimpse_params(wg, bg, wl, bl, wgg, bgg, wlg, blg)

    out = glimpse_network_forward(glimpse, location, params, out_size)
    out = jax.block_until_ready(out)

    # Plain-JAX reference with PyTorch-convention math.
    hg_ref = jnp.maximum(glimpse @ wg.T + bg, 0.0)
    hl_ref = jnp.maximum(location @ wl.T + bl, 0.0)
    ref = jnp.maximum(hg_ref @ wgg.T + bgg + hl_ref @ wlg.T + blg, 0.0)

    assert out.shape == (batch, output_size)
    assert jnp.allclose(out, ref, atol=1e-4, rtol=1e-4)

    print("KERNEL_OK")
</pallas_src>

<mosaic_0001>
module attributes {stable_mosaic.version = 11 : i64} {
  func.func @glimpse_network_kernel(%arg0: memref<8x64xf32, #tpu.memory_space<vmem>>, %arg1: memref<8x8xf32, #tpu.memory_space<vmem>>, %arg2: memref<64x128xf32, #tpu.memory_space<vmem>>, %arg3: memref<1x128xf32, #tpu.memory_space<vmem>>, %arg4: memref<8x128xf32, #tpu.memory_space<vmem>>, %arg5: memref<1x128xf32, #tpu.memory_space<vmem>>, %arg6: memref<128x128xf32, #tpu.memory_space<vmem>>, %arg7: memref<1x128xf32, #tpu.memory_space<vmem>>, %arg8: memref<128x128xf32, #tpu.memory_space<vmem>>, %arg9: memref<1x128xf32, #tpu.memory_space<vmem>>, %arg10: memref<8x128xf32, #tpu.memory_space<vmem>>) attributes {dimension_semantics = [], scalar_prefetch = 0 : i64, scratch_operands = 0 : i64, tpu.core_type = #tpu.core_type<tc>} {
    %c0 = arith.constant 0 : index
    %c0_0 = arith.constant 0 : index
    %0 = vector.load %arg0[%c0, %c0_0] : memref<8x64xf32, #tpu.memory_space<vmem>>, vector<8x64xf32>
    %c0_1 = arith.constant 0 : index
    %c0_2 = arith.constant 0 : index
    %1 = vector.load %arg2[%c0_1, %c0_2] : memref<64x128xf32, #tpu.memory_space<vmem>>, vector<64x128xf32>
    %cst = arith.constant dense<0.000000e+00> : vector<8x128xf32>
    %2 = tpu.matmul %0, %1, %cst {dimension_numbers = #tpu.dot_dimension_numbers<[1], [0], [0], [1], [0, 0, 1, 1], [], []>} : vector<8x64xf32>, vector<64x128xf32>, vector<8x128xf32> -> vector<8x128xf32>
    %c0_3 = arith.constant 0 : index
    %c0_4 = arith.constant 0 : index
    %3 = vector.load %arg3[%c0_3, %c0_4] : memref<1x128xf32, #tpu.memory_space<vmem>>, vector<1x128xf32>
    %4 = vector.broadcast %3 : vector<1x128xf32> to vector<8x128xf32>
    %5 = arith.addf %2, %4 : vector<8x128xf32>
    %cst_5 = arith.constant 0.000000e+00 : f32
    %6 = vector.broadcast %cst_5 : f32 to vector<8x128xf32>
    %7 = arith.maximumf %5, %6 : vector<8x128xf32>
    %c0_6 = arith.constant 0 : index
    %c0_7 = arith.constant 0 : index
    %8 = vector.load %arg1[%c0_6, %c0_7] : memref<8x8xf32, #tpu.memory_space<vmem>>, vector<8x8xf32>
    %c0_8 = arith.constant 0 : index
    %c0_9 = arith.constant 0 : index
    %9 = vector.load %arg4[%c0_8, %c0_9] : memref<8x128xf32, #tpu.memory_space<vmem>>, vector<8x128xf32>
    %cst_10 = arith.constant dense<0.000000e+00> : vector<8x128xf32>
    %10 = tpu.matmul %8, %9, %cst_10 {dimension_numbers = #tpu.dot_dimension_numbers<[1], [0], [0], [1], [0, 0, 1, 1], [], []>} : vector<8x8xf32>, vector<8x128xf32>, vector<8x128xf32> -> vector<8x128xf32>
    %c0_11 = arith.constant 0 : index
    %c0_12 = arith.constant 0 : index
    %11 = vector.load %arg5[%c0_11, %c0_12] : memref<1x128xf32, #tpu.memory_space<vmem>>, vector<1x128xf32>
    %12 = vector.broadcast %11 : vector<1x128xf32> to vector<8x128xf32>
    %13 = arith.addf %10, %12 : vector<8x128xf32>
    %cst_13 = arith.constant 0.000000e+00 : f32
    %14 = vector.broadcast %cst_13 : f32 to vector<8x128xf32>
    %15 = arith.maximumf %13, %14 : vector<8x128xf32>
    %c0_14 = arith.constant 0 : index
    %c0_15 = arith.constant 0 : index
    %16 = vector.load %arg6[%c0_14, %c0_15] : memref<128x128xf32, #tpu.memory_space<vmem>>, vector<128x128xf32>
    %cst_16 = arith.constant dense<0.000000e+00> : vector<8x128xf32>
    %17 = tpu.matmul %7, %16, %cst_16 {dimension_numbers = #tpu.dot_dimension_numbers<[1], [0], [0], [1], [0, 0, 1, 1], [], []>} : vector<8x128xf32>, vector<128x128xf32>, vector<8x128xf32> -> vector<8x128xf32>
    %c0_17 = arith.constant 0 : index
    %c0_18 = arith.constant 0 : index
    %18 = vector.load %arg8[%c0_17, %c0_18] : memref<128x128xf32, #tpu.memory_space<vmem>>, vector<128x128xf32>
    %cst_19 = arith.constant dense<0.000000e+00> : vector<8x128xf32>
    %19 = tpu.matmul %15, %18, %cst_19 {dimension_numbers = #tpu.dot_dimension_numbers<[1], [0], [0], [1], [0, 0, 1, 1], [], []>} : vector<8x128xf32>, vector<128x128xf32>, vector<8x128xf32> -> vector<8x128xf32>
    %20 = arith.addf %17, %19 : vector<8x128xf32>
    %c0_20 = arith.constant 0 : index
    %c0_21 = arith.constant 0 : index
    %21 = vector.load %arg7[%c0_20, %c0_21] : memref<1x128xf32, #tpu.memory_space<vmem>>, vector<1x128xf32>
    %22 = vector.broadcast %21 : vector<1x128xf32> to vector<8x128xf32>
    %23 = arith.addf %20, %22 : vector<8x128xf32>
    %c0_22 = arith.constant 0 : index
    %c0_23 = arith.constant 0 : index
    %24 = vector.load %arg9[%c0_22, %c0_23] : memref<1x128xf32, #tpu.memory_space<vmem>>, vector<1x128xf32>
    %25 = vector.broadcast %24 : vector<1x128xf32> to vector<8x128xf32>
    %26 = arith.addf %23, %25 : vector<8x128xf32>
    %cst_24 = arith.constant 0.000000e+00 : f32
    %27 = vector.broadcast %cst_24 : f32 to vector<8x128xf32>
    %28 = arith.maximumf %26, %27 : vector<8x128xf32>
    %c0_25 = arith.constant 0 : index
    %c0_26 = arith.constant 0 : index
    %29 = vector.load %arg10[%c0_25, %c0_26] : memref<8x128xf32, #tpu.memory_space<vmem>>, vector<8x128xf32>
    tpu.vector_store %arg10[%c0_25, %c0_26], %28 {strides = array<i32>} : memref<8x128xf32, #tpu.memory_space<vmem>>, vector<8x128xf32>,
    return
  }
}

</mosaic_0001>

<bundles_post_ra>
// kernel: glimpse_network_forward.1
= control target key start
LH: loop header
LB: loop body
LE: loop exit
PB: predicated region body
PF: predicated region fallthrough
CT: control target
= control target key end

     0   :  { %15 = vsyncpa [#allocation3], 0  ;;  %s587_s0 = inlined_call_operand.hbm [shape: f32[8,64], index: 0, kind: input, shape index: {}]   ;;  %s588_s1 = inlined_call_operand.hbm [shape: f32[8,8], index: 1, kind: input, shape index: {}]   ;;  %s589_s2 = inlined_call_operand.hbm [shape: f32[64,128], index: 2, kind: input, shape index: {}]   ;;  %s590_s3 = inlined_call_operand.vmem [shape: f32[1,128], index: 3, kind: input, shape index: {}]   ;;  %s591_s4 = inlined_call_operand.hbm [shape: f32[8,128], index: 4, kind: input, shape index: {}]   ;;  %s592_s5 = inlined_call_operand.vmem [shape: f32[1,128], index: 5, kind: input, shape index: {}]   ;;  %s593_s6 = inlined_call_operand.hbm [shape: f32[128,128], index: 6, kind: input, shape index: {}]   ;;  %s594_s7 = inlined_call_operand.vmem [shape: f32[1,128], index: 7, kind: input, shape index: {}]   ;;  %s595_s8 = inlined_call_operand.hbm [shape: f32[128,128], index: 8, kind: input, shape index: {}]   ;;  %s596_s9 = inlined_call_operand.vmem [shape: f32[1,128], index: 9, kind: input, shape index: {}]   ;;  %s597_s10 = inlined_call_operand.hbm [shape: f32[8,128], index: 10, kind: output, shape index: {}]  }
   0x1   :  { %16 = vsyncpa [#allocation6], 0 }
   0x2   :  { %17 = vsyncpa [#allocation9], 0 }
   0x3   :  { %18 = vsyncpa [#allocation12], 0  ;;  %s36_s15 = sshll.u32 %s588_s1, 4  ;;  %s37_s15 = int_to_ptr.hbm [resolvable:$true] %s36_s15 }
   0x4   :  { %19 = vsyncpa [#allocation4], 0  ;;  %s490_s16 = smov [#allocation5]   ;;  %s62_s20 = sshll.u32 %s591_s4, 4  ;;  %s63_s20 = int_to_ptr.hbm [resolvable:$true] %s62_s20 }
   0x5   :  { %s38_s17 = sshll.u32 %s490_s16, 4  ;;  %s491_s21 = smov [#allocation8]   ;;  %s39_s17 = int_to_ptr.vmem [resolvable:$true] %s38_s17 }
   0x6   :  { %41 = dma.hbm_to_vmem [thread:$0]  %s37_s15, 128, %s39_s17, [#allocation6]  }
   0x7   :  { %s64_s22 = sshll.u32 %s491_s21, 4  ;;  %s25_s25 = sshll.u32 %s587_s0, 4  ;;  %s65_s22 = int_to_ptr.vmem [resolvable:$true] %s64_s22  ;;  %s26_s25 = int_to_ptr.hbm [resolvable:$true] %s25_s25 }
   0x8   :  { %67 = dma.hbm_to_vmem [thread:$0]  %s63_s20, 128, %s65_s22, [#allocation9]  }
   0x9   :  { %s46_s27 = sshll.u32 %s589_s2, 4  ;;  %s492_s28 = smov [#allocation2]   ;;  %s47_s27 = int_to_ptr.hbm [resolvable:$true] %s46_s27 }
   0xa   :  { %s27_s29 = sshll.u32 %s492_s28, 4  ;;  %s493_s4 = smov [#allocation7]   ;;  %s28_s29 = int_to_ptr.vmem [resolvable:$true] %s27_s29 }
   0xb   :  { %30 = dma.hbm_to_vmem [thread:$0]  %s26_s25, 128, %s28_s29, [#allocation3]  }
   0xc   :  { %s48_s30 = sshll.u32 %s493_s4, 4  ;;  %s494_s11 = smov 128   ;;  %s49_s30 = int_to_ptr.vmem [resolvable:$true] %s48_s30 }
   0xd   :  { %s495_s12 = smov 8   ;;  %s74_s14 = sshll.u32 %s593_s6, 4  ;;  %s75_s14 = int_to_ptr.hbm [resolvable:$true] %s74_s14 }
   0xe   :  { %54 = dma.hbm_to_vmem [thread:$0]  %s47_s27, 1024, %s49_s30, [#allocation6], %s494_s11, %s494_s11, %s495_s12  }
   0xf   :  { %s496_s15 = smov [#allocation10]   ;;  %s89_s18 = sshll.u32 %s595_s8, 4  ;;  %s90_s18 = int_to_ptr.hbm [resolvable:$true] %s89_s18 }
  0x10   :  { %s76_s16 = sshll.u32 %s496_s15, 4  ;;  %s497_s19 = smov [#allocation11]   ;;  %s77_s16 = int_to_ptr.vmem [resolvable:$true] %s76_s16 }
  0x11   :  { %82 = dma.hbm_to_vmem [thread:$0]  %s75_s14, 2048, %s77_s16, [#allocation9], %s494_s11, %s494_s11, %s495_s12  }
  0x12   :  { %s91_s20 = sshll.u32 %s497_s19, 4  ;;  %s92_s20 = int_to_ptr.vmem [resolvable:$true] %s91_s20 }
  0x13   :  { %97 = dma.hbm_to_vmem [thread:$0]  %s90_s18, 2048, %s92_s20, [#allocation12], %s494_s11, %s494_s11, %s495_s12  }
  0x14   :  { %480 = dma.done.wait [#allocation3], 128  }
  0x15   :  { %481 = vsyncadd [#allocation3], 4294967168 }
  0x16   :  { %482 = dma.done.wait [#allocation6], 1152  }
  0x17   :  { %483 = vsyncadd [#allocation6], 4294966144 }
  0x18   :  { %484 = dma.done.wait [#allocation9], 2176  }
  0x19   :  { %485 = vsyncadd [#allocation9], 4294965120 }
  0x1a   :  { %486 = dma.done.wait [#allocation12], 2048  }
  0x1b   :  { %487 = vsyncadd [#allocation12], 4294965248  ;;  %v132_v0 = vld [vmem:[#allocation7 + $0x38] sm:$0xff]  ;;  %v131_v1 = vld [vmem:[#allocation7 + $0x30] sm:$0xff]  ;;  %vm168_vm0 = vcmask 64512   ;;  %vm137_vm1 = vcmask 523264  }
  0x1c   :  { %149 = vmatpush.msra.mxu0 %v132_v0  ;;  %v130_v2 = vld [vmem:[#allocation7 + $0x28] sm:$0xff]  ;;  %v163_v3 = vld [vmem:[#allocation8] sm:$0xff]  ;;  %v162_v5 = vld [vmem:[#allocation5] sm:$0xff]  ;;  %s498_s1 = smov [#allocation13]   ;;  %s284_s28 = sshll.u32 %s597_s10, 4  ;;  %s285_s28 = int_to_ptr.hbm [resolvable:$true] %s284_s28 }
  0x1d   :  { %v129_v4 = vld [vmem:[#allocation7 + $0x20] sm:$0xff]  ;;  %187 = vmatpush.msra.mxu1 %v163_v3  ;;  %v223_v8 = vld [vmem:[#allocation11 + $0x70] sm:$0xff]  ;;  %v222_v10 = vld [vmem:[#allocation11 + $0x68] sm:$0xff]  ;;  %s282_s26 = sshll.u32 %s498_s1, 4  ;;  %s283_s26 = int_to_ptr.vmem [resolvable:$true] %s282_s26 }
  0x1e   :  { %150 = vmatpush.msra.mxu0 %v131_v1  ;;  %v224_v6 = vld [vmem:[#allocation11 + $0x78] sm:$0xff]  ;;  %298 = vmatmul.msk.f32.vlgmr.msra.gmra.mxu1 %vm168_vm0, %v162_v5  ;;  %v207_v9 = vld [vmem:[#allocation10 + $0x70] sm:$0xff]  ;;  %v206_v12 = vld [vmem:[#allocation10 + $0x68] sm:$0xff] }
  0x1f   :  { %225 = vmatpush.msra.mxu2 %v224_v6  ;;  %v208_v7 = vld [vmem:[#allocation10 + $0x78] sm:$0xff]  ;;  %v128_v11 = vld [vmem:[#allocation7 + $0x18] sm:$0xff]  ;;  %v221_v13 = vld [vmem:[#allocation11 + $0x60] sm:$0xff] }
  0x20   :  { %151 = vmatpush.msra.mxu0 %v130_v2  ;;  %245 = vmatpush.msra.mxu3 %v208_v7  ;;  %v127_v14 = vld [vmem:[#allocation7 + $0x10] sm:$0xff]  ;;  %v205_v15 = vld [vmem:[#allocation10 + $0x60] sm:$0xff]  ;;  %v220_v16 = vld [vmem:[#allocation11 + $0x58] sm:$0xff] }
  0x21   :  { %226 = vmatpush.msra.mxu2 %v223_v8  ;;  %v126_v17 = vld [vmem:[#allocation7 + $0x8] sm:$0xff]  ;;  %v204_v18 = vld [vmem:[#allocation10 + $0x58] sm:$0xff]  ;;  %v124_v20 = vld [vmem:[#allocation2] sm:$0xff] }
  0x22   :  { %152 = vmatpush.msra.mxu0 %v129_v4  ;;  %246 = vmatpush.msra.mxu3 %v207_v9  ;;  %v125_v19 = vld [vmem:[#allocation7] sm:$0xff]  ;;  %v219_v21 = vld [vmem:[#allocation11 + $0x50] sm:$0xff]  ;;  %v218_v23 = vld [vmem:[#allocation11 + $0x48] sm:$0xff] }
  0x23   :  { %227 = vmatpush.msra.mxu2 %v222_v10  ;;  %v203_v22 = vld [vmem:[#allocation10 + $0x50] sm:$0xff]  ;;  %v202_v24 = vld [vmem:[#allocation10 + $0x48] sm:$0xff]  ;;  %v217_v25 = vld [vmem:[#allocation11 + $0x40] sm:$0xff] }
  0x24   :  { %153 = vmatpush.msra.mxu0 %v128_v11  ;;  %247 = vmatpush.msra.mxu3 %v206_v12  ;;  %v201_v26 = vld [vmem:[#allocation10 + $0x40] sm:$0xff]  ;;  %v216_v27 = vld [vmem:[#allocation11 + $0x38] sm:$0xff]  ;;  %v215_v29 = vld [vmem:[#allocation11 + $0x30] sm:$0xff] }
  0x25   :  { %228 = vmatpush.msra.mxu2 %v221_v13  ;;  %v200_v28 = vld [vmem:[#allocation10 + $0x38] sm:$0xff]  ;;  %v199_v30 = vld [vmem:[#allocation10 + $0x30] sm:$0xff]  ;;  %v214_v31 = vld [vmem:[#allocation11 + $0x28] sm:$0xff] }
  0x26   :  { %154 = vmatpush.msra.mxu0 %v127_v14  ;;  %248 = vmatpush.msra.mxu3 %v205_v15  ;;  %v198_v32 = vld [vmem:[#allocation10 + $0x28] sm:$0xff]  ;;  %v213_v33 = vld [vmem:[#allocation11 + $0x20] sm:$0xff]  ;;  %v212_v35 = vld [vmem:[#allocation11 + $0x18] sm:$0xff] }
  0x27   :  { %229 = vmatpush.msra.mxu2 %v220_v16  ;;  %v197_v34 = vld [vmem:[#allocation10 + $0x20] sm:$0xff]  ;;  %v196_v36 = vld [vmem:[#allocation10 + $0x18] sm:$0xff]  ;;  %v211_v37 = vld [vmem:[#allocation11 + $0x10] sm:$0xff] }
  0x28   :  { %155 = vmatpush.msra.mxu0 %v126_v17  ;;  %249 = vmatpush.msra.mxu3 %v204_v18  ;;  %v195_v38 = vld [vmem:[#allocation10 + $0x10] sm:$0xff]  ;;  %v210_v39 = vld [vmem:[#allocation11 + $0x8] sm:$0xff]  ;;  %v209_v41 = vld [vmem:[#allocation11] sm:$0xff] }
  0x29   :  { %230 = vmatpush.msra.mxu2 %v219_v21  ;;  %v194_v40 = vld [vmem:[#allocation10 + $0x8] sm:$0xff]  ;;  %v193_v42 = vld [vmem:[#allocation10] sm:$0xff] }
  0x2a   :  { %156 = vmatpush.msra.mxu0 %v125_v19  ;;  %250 = vmatpush.msra.mxu3 %v203_v22  ;;  %v309_v43 = vld [vmem:[%s592_s5] ss:$0 sm:$0xff] }
  0x2b   :  { %297 = vmatmul.msk.f32.vlgmr.msra.gmra.mxu0 %vm137_vm1, %v124_v20  ;;  %231 = vmatpush.msra.mxu2 %v218_v23  ;;  %v308_v47 = vld [vmem:[%s590_s3] ss:$0 sm:$0xff] }
  0x2c   :  { %251 = vmatpush.msra.mxu3 %v202_v24  ;;  %v310_v52 = vld [vmem:[%s594_s7] ss:$0 sm:$0xff] }
  0x2d   :  { %232 = vmatpush.msra.mxu2 %v217_v25  ;;  %v311_v55 = vld [vmem:[%s596_s9] ss:$0 sm:$0xff] }
  0x2e   :  { %252 = vmatpush.msra.mxu3 %v201_v26 }
  0x2f   :  { %233 = vmatpush.msra.mxu2 %v216_v27 }
  0x30   :  { %253 = vmatpush.msra.mxu3 %v200_v28 }
  0x31   :  { %234 = vmatpush.msra.mxu2 %v215_v29 }
  0x32   :  { %254 = vmatpush.msra.mxu3 %v199_v30 }
  0x33   :  { %235 = vmatpush.msra.mxu2 %v214_v31 }
  0x34   :  { %255 = vmatpush.msra.mxu3 %v198_v32 }
  0x35   :  { %236 = vmatpush.msra.mxu2 %v213_v33 }
  0x36   :  { %256 = vmatpush.msra.mxu3 %v197_v34 }
  0x37   :  { %237 = vmatpush.msra.mxu2 %v212_v35 }
  0x38   :  { %257 = vmatpush.msra.mxu3 %v196_v36 }
  0x39   :  { %238 = vmatpush.msra.mxu2 %v211_v37 }
  0x3a   :  { %258 = vmatpush.msra.mxu3 %v195_v38 }
  0x3b   :  { %239 = vmatpush.msra.mxu2 %v210_v39 }
  0x3c   :  { %259 = vmatpush.msra.mxu3 %v194_v40 }
  0x3d   :  { %240 = vmatpush.msra.mxu2 %v209_v41 }
  0x3e   :  { %260 = vmatpush.msra.mxu3 %v193_v42 }
  0x9b   :  { %v189_v44 = vpop.f32.mrf.mxu1 }
  0x9c   :  { %v190_v45 = vadd.f32 %v309_v43, %v189_v44 }
  0x9e   :  { %v192_v46 = vmax.f32 %v190_v45, 0.0 }
  0xa0   :  { %241 = vmatmul.f32.vlgmr.msra.gmra.mxu2 %v192_v46 }
  0xa8   :  { %v158_v48 = vpop.f32.mrf.mxu0 }
  0xa9   :  { %v159_v49 = vadd.f32 %v308_v47, %v158_v48 }
  0xab   :  { %v161_v50 = vmax.f32 %v159_v49, 0.0 }
  0xad   :  { %261 = vmatmul.f32.vlgmr.msra.gmra.mxu3 %v161_v50 }
 0x123   :  { %v242_v51 = vpop.f32.mrf.mxu2 }
 0x130   :  { %v262_v53 = vpop.f32.mrf.mxu3 }
 0x131   :  { %v263_v54 = vadd.f32 %v262_v53, %v242_v51 }
 0x133   :  { %v269_v56 = vadd.f32 %v310_v52, %v263_v54 }
 0x135   :  { %v274_v57 = vadd.f32 %v311_v55, %v269_v56 }
 0x137   :  { %v275_v58 = vmax.f32 %v274_v57, 0.0 }
 0x139   :  { %276 = vst [vmem:[#allocation13] sm:$0xff] %v275_v58 }
 0x13a   :  { %287 = dma.vmem_to_hbm [thread:$0]  %s283_s26, 128, %s285_s28, [#allocation4]  }
 0x13b   :  { %488 = dma.done.wait [#allocation4], 128  }
 0x13c   :  { %489 = vsyncadd [#allocation4], 4294967168 }
 0x13d   :  { %292 = vsyncpa [#allocation3], 1 }
 0x13e   :  { %293 = vsyncpa [#allocation6], 1 }
 0x13f   :  { %294 = vsyncpa [#allocation9], 1 }
 0x140   :  { %295 = vsyncpa [#allocation12], 1 }
 0x141   :  { %296 = vsyncpa [#allocation4], 1 }

</bundles_post_ra>
